<compile_context>
chip_gen: v7x
topology: tpu7x:2x2x1
jax: 0.10.0
libtpu: 0.0.40
codegen_flags: <defaults>
</compile_context>

<pallas_src>
import functools

import jax
import jax.numpy as jnp
from jax.experimental import pallas as pl
from jax.experimental.pallas import tpu as pltpu


# ---------------------------------------------------------------------------
# Kernels
# ---------------------------------------------------------------------------
def _identity_kernel(x_ref, o_ref):
    # forward: output = input * 1.0  -> plain copy of the VMEM tile
    o_ref[...] = x_ref[...]


def _neg_scale_kernel(g_ref, o_ref, *, coeff):
    # backward: grad_input = -coeff * grad_output
    o_ref[...] = g_ref[...] * jnp.asarray(-coeff, dtype=g_ref.dtype)


# ---------------------------------------------------------------------------
# Tiled element-wise launcher (shared by forward and backward)
# ---------------------------------------------------------------------------
def _elementwise_pallas(x: jax.Array, body) -> jax.Array:
    orig_shape = x.shape
    if x.ndim == 0:
        x2 = x.reshape(1, 1)
    elif x.ndim == 1:
        x2 = x.reshape(1, x.shape[0])
    else:
        x2 = x.reshape(-1, x.shape[-1])
    rows, cols = x2.shape
    itemsize = x2.dtype.itemsize

    if rows % 8 == 0 and cols % 128 == 0:
        # Lane-dense tiled path: full feature dim on lanes, TB rows per step.
        # Cap total double-buffered VMEM (in + out, 2 buffers each) to ~8 MiB so
        # it fits the default scoped VMEM on v5e/v6e/v7x without tuning flags.
        budget_bytes = 8 * 1024 * 1024
        bytes_per_row = cols * itemsize * 4  # in + out, double buffered
        tb = max(8, min(rows, budget_bytes // bytes_per_row))
        tb = max(8, (tb // 8) * 8)
        if rows >= 16:
            # Prefer at least 2 grid steps so v7x shards across both TensorCores.
            tb = min(tb, max(8, (rows // 2 // 8) * 8))
        tb = min(tb, rows)
        while rows % tb != 0:
            tb -= 8
        grid = (rows // tb,)
        in_specs = [pl.BlockSpec((tb, cols), lambda i: (i, 0))]
        out_specs = pl.BlockSpec((tb, cols), lambda i: (i, 0))
    else:
        # Shape not (8, 128)-aligned: single full-array block (always legal).
        grid = (1,)
        in_specs = [pl.BlockSpec((rows, cols), lambda i: (0, 0))]
        out_specs = pl.BlockSpec((rows, cols), lambda i: (0, 0))

    out = pl.pallas_call(
        body,
        out_shape=jax.ShapeDtypeStruct((rows, cols), x2.dtype),
        grid_spec=pltpu.PrefetchScalarGridSpec(
            num_scalar_prefetch=0,
            grid=grid,
            in_specs=in_specs,
            out_specs=out_specs,
        ),
        compiler_params=pltpu.CompilerParams(
            dimension_semantics=("parallel",),
        ),
        cost_estimate=pl.CostEstimate(
            flops=x2.size,
            transcendentals=0,
            bytes_accessed=2 * x2.size * itemsize,
        ),
    )(x2)
    return out.reshape(orig_shape)


# ---------------------------------------------------------------------------
# GradientReverseLayer: identity forward, reversed (scaled, negated) gradient
# ---------------------------------------------------------------------------
@functools.partial(jax.custom_vjp, nondiff_argnums=(1,))
def gradient_reverse(x: jax.Array, coeff: float = 1.0) -> jax.Array:
    return _elementwise_pallas(x, _identity_kernel)


def _gradient_reverse_fwd(x, coeff):
    return _elementwise_pallas(x, _identity_kernel), None


def _gradient_reverse_bwd(coeff, _residual, g):
    grad_in = _elementwise_pallas(
        g, functools.partial(_neg_scale_kernel, coeff=coeff)
    )
    return (grad_in,)


gradient_reverse.defvjp(_gradient_reverse_fwd, _gradient_reverse_bwd)


def gradient_reverse_ref(x: jax.Array) -> jax.Array:
    # Pure-JAX forward reference (identity).
    return x * 1.0


if __name__ == "__main__":
    key = jax.random.PRNGKey(0)
    k1, k2 = jax.random.split(key)

    # Aligned feature tensor: (batch=16, hidden=256) -> tiled (8,128)-aligned path.
    x1 = jax.random.normal(k1, (16, 256), dtype=jnp.float32)
    y1 = gradient_reverse(x1, 1.0)
    jax.block_until_ready(y1)
    assert y1.shape == x1.shape, y1.shape
    assert jnp.allclose(y1, gradient_reverse_ref(x1), atol=0, rtol=0), "fwd mismatch (aligned)"

    # Unaligned tensor: (2, 4, 16, 16) -> single full-array block fallback.
    x2 = jax.random.normal(k2, (2, 4, 16, 16), dtype=jnp.float32)
    y2 = gradient_reverse(x2, 2.0)
    jax.block_until_ready(y2)
    assert y2.shape == x2.shape, y2.shape
    assert jnp.allclose(y2, gradient_reverse_ref(x2), atol=0, rtol=0), "fwd mismatch (unaligned)"

    # Gradient reversal: d/dx sum(GRL(x, coeff)) == -coeff everywhere.
    coeff = 0.5
    g = jax.grad(lambda x: jnp.sum(gradient_reverse(x, coeff)))(x1)
    jax.block_until_ready(g)
    assert jnp.allclose(g, -coeff * jnp.ones_like(x1), atol=1e-6, rtol=1e-6), "bwd mismatch"

    print("KERNEL_OK")
</pallas_src>

<mosaic_0001>
module attributes {stable_mosaic.version = 11 : i64} {
  func.func @_identity_kernel(%arg0: i32, %arg1: memref<8x256xf32, #tpu.memory_space<vmem>>, %arg2: memref<8x256xf32, #tpu.memory_space<vmem>>) attributes {dimension_semantics = [#tpu.dimension_semantics<parallel>], iteration_bounds = array<i64: 2>, scalar_prefetch = 0 : i64, scratch_operands = 0 : i64, tpu.core_type = #tpu.core_type<tc>, window_params = [{transform_indices = @transform_0, window_bounds = array<i64: 8, 256>}, {transform_indices = @transform_1, window_bounds = array<i64: 8, 256>}]} {
    %c0 = arith.constant 0 : index
    %c0_0 = arith.constant 0 : index
    %0 = vector.load %arg1[%c0, %c0_0] : memref<8x256xf32, #tpu.memory_space<vmem>>, vector<8x256xf32>
    %c0_1 = arith.constant 0 : index
    %c0_2 = arith.constant 0 : index
    %1 = vector.load %arg2[%c0_1, %c0_2] : memref<8x256xf32, #tpu.memory_space<vmem>>, vector<8x256xf32>
    tpu.vector_store %arg2[%c0_1, %c0_2], %0 {strides = array<i32>} : memref<8x256xf32, #tpu.memory_space<vmem>>, vector<8x256xf32>,
    return
  }
  func.func @transform_0(%arg0: i32) -> (i32, i32) {
    %c0_i32 = arith.constant 0 : i32
    %c0_i32_0 = arith.constant 0 : i32
    return %arg0, %c0_i32 : i32, i32
  }
  func.func @transform_1(%arg0: i32) -> (i32, i32) {
    %c0_i32 = arith.constant 0 : i32
    %c0_i32_0 = arith.constant 0 : i32
    return %arg0, %c0_i32 : i32, i32
  }
}

</mosaic_0001>

<bundles_post_ra>
// kernel: tpu_custom_call.1
= control target key start
LH: loop header
LB: loop body
LE: loop exit
PB: predicated region body
PF: predicated region fallthrough
CT: control target
= control target key end

     0   :  { %6 = vsyncpa [#allocation3], 0  ;;  %s555_s0 = inlined_call_operand.hbm [shape: f32[16,256], index: 0, kind: input, shape index: {}]   ;;  %s556_s1 = inlined_call_operand.hbm [shape: f32[16,256], index: 1, kind: output, shape index: {}]  }
   0x1   :  { %8 = vsyncpa [#allocation3 + $0x1], 0 }
   0x2   :  { %9 = vsyncpa [#allocation4], 0 }
   0x3   :  { %11 = vsyncpa [#allocation4 + $0x1], 0  ;;  %s394_s6 = smov 0   ;;  %s396_s7 = smov 0  }
   0x4   :  { %s398_s8 = smov 0   ;;  %s400_s9 = smov 0  }
   0x5 LB: > { %s415_s10 = sadd.s32 4294967295, %s380_s9   ;;  %s222_s11 = sadd.s32 4294967294, %s380_s9   ;;  %s380_s9 = sphi %s400_s9, %s571_s9   ;;  %s376_s8 = sphi %s398_s8, %s570_s8   ;;  %s372_s7 = sphi %s396_s7, %s569_s7   ;;  %s368_s6 = sphi %s394_s6, %s568_s6  }
   0x6   : > { %s419_s12 = sadd.s32 1, %s380_s9   ;;  %s24_s13 = sadd.s32 1, %s376_s8 }
   0x7   : > { %s21_s14 = ssub.s32 %s380_s9, %s419_s12  ;;  %p31_p0 = scmp.ne.s32.totalorder %s376_s8, %s372_s7 }
   0x8   : > { %p22_p1 = scmp.eq.s32.totalorder %s21_s14, 0  ;;  %p32_p2 = scmp.eq.s32.totalorder %s380_s9, 0 }
   0x9   : > { %p37_p3 = scmp.ne.s32.totalorder %s372_s7, %s368_s6  ;;  %p38_p4 = scmp.eq.s32.totalorder %s415_s10, 0 }
   0xa   : > { %s431_s15 = scalar_select %p22_p1, %s376_s8, %s24_s13  }
   0xb   : > { %p433_p5 = por %p32_p2, %p31_p0  ;;  %p437_p6 = por %p38_p4, %p37_p3 }
   0xc   : > { %p61_p7 = scmp.eq.s32.totalorder %s415_s10, 1  ;;  %p67_p8 = scmp.eq.s32.totalorder %s222_s11, 1 }
   0xd   : > { %p250_p10 = scmp.lt.s32.totalorder %s380_s9, 2  ;;  %s87_s20 = sand.u32 1, %s376_s8  }
   0xe   : > { %p444_p11 = por %p61_p7, %p31_p0  ;;  %p448_p12 = por %p67_p8, %p37_p3 }
   0xf   : > { %s236_s21 = sshll.u32 %s380_s9, 8  ;;  %s225_s22 = sshll.u32 %s87_s20, 4 }
  0x10   : > { %s560_s18 = scalar_select %p444_p11, 1, 0 }
  0x11   : > { %s561_s19 = scalar_select %p448_p12, 1, 0 }
  0x12   : > { %s457_s25 = scalar_lea.hbm %s555_s0, %s236_s21  ;;  %s91_s26 = scalar_lea.vmem [#allocation2], %s225_s22 }
  0x13   : > { %s99_s27 = sshll.u32 %s91_s26, 4  ;;  %p461_p13 = pnand %p250_p10, %p433_p5  ;;  %s465_s27 = int_to_ptr.vmem [resolvable:$true] %s99_s27 }
  0x14   : > { %s88_s29 = scalar_lea.sflag [#allocation3], %s87_s20  ;;  %s284_s30 = scalar_lea.hbm %s457_s25, 256 }
  0x15   : > { %p285_p2 = scmp.ne.s32.totalorder %s457_s25, %s284_s30  ;;  %p286_p3 = pneg %p461_p13 }
  0x16   : > { %s289_s4 = scalar_lea.hbm %s555_s0, 512  ;;  %p290_p5 = scmp.lt.u32.totalorder %s457_s25, %s555_s0 }
  0x17   : > { %p287_p4 = pnand %p286_p3, %p285_p2  ;;  %p291_p8 = scmp.lt.u32.totalorder %s289_s4, %s284_s30 }
  0x18   : > { %p293_p9 = scmp.lt.u32.totalorder %s284_s30, %s457_s25 }
  0x19   : > { %p288_p7 = pneg %p287_p4  ;;  %p292_p10 = por %p291_p8, %p290_p5 }
  0x1b   : > { %p294_p0 = por %p293_p9, %p292_p10 }
  0x1d   : > { %p295_p1 = pnand %p294_p0, %p288_p7 }
  0x1f   : > { %298 = shalt.err (!%p295_p1)
}
  0x20   : > { %s299_s13 = scalar_lea.vmem %s465_s27, 256  ;;  %s382_s14 = smov [#allocation2]  }
  0x21   : > { %p300_p2 = scmp.ne.s32.totalorder %s465_s27, %s299_s13  ;;  %s304_s16 = sshll.u32 %s382_s14, 4  ;;  %s305_s16 = int_to_ptr.vmem [resolvable:$false] %s304_s16 }
  0x22   : > { %s306_s20 = scalar_lea.vmem %s305_s16, 512  ;;  %p307_p11 = scmp.lt.s32.totalorder %s465_s27, %s305_s16 }
  0x23   : > { %p302_p4 = pnand %p300_p2, %p286_p3  ;;  %p308_p5 = scmp.lt.s32.totalorder %s306_s20, %s299_s13 }
  0x25   : > { %p303_p12 = pneg %p302_p4  ;;  %p309_p8 = por %p308_p5, %p307_p11 }
  0x27   : > { %p310_p9 = pnand %p309_p8, %p303_p12 }
  0x29   : > { %313 = shalt.err (!%p310_p9)
}
  0x2a   : > { %245 = dma.hbm_to_vmem [thread:$0]  (!%p461_p13), %s457_s25, 256, %s465_s27, %s88_s29  }
  0x2b   : > { %p563_p0 = scmp.lt.s32.totalorder %s380_s9, 3  ;;  %p564_p1 = scmp.ge.s32.totalorder %s380_s9, 1 }
  0x2d   : > { %p105_p3 = pnand %p564_p1, %p563_p0 }
  0x2e   : > { %s499_s21 = sand.u32 (!%p105_p3), 1, %s372_s7  }
  0x2f   : > { %108 = sbr.rel (%p105_p3) target bundleno = 81 (0x51), region = 24  ;;  %s229_s22 = sshll.u32 (!%p105_p3), %s499_s21, 4 }
  0x30   : > { %s111_s23 = scalar_lea.sflag (!%p105_p3), [#allocation3], %s499_s21  ;;  %s114_s24 = scalar_lea.vmem (!%p105_p3), [#allocation2], %s229_s22 }
  0x36   : > { %359 = dma.done.wait (%p437_p6), %s111_s23, 256  }
  0x37   : > { %361 = vsyncadd (%p437_p6), %s111_s23, 4294967040  ;;  %s132_s25 = scalar_lea.vmem [#allocation5], %s229_s22  ;;  %s237_s27 = sshll.u32 %s415_s10, 8  ;;  %v133_v0 = vld [vmem:[%s114_s24] sm:$0xff]  ;;  %v134_v1 = vld [vmem:[%s114_s24 + $0x8] sm:$0xff] }
  0x38   : > { %s152_s26 = sshll.u32 %s132_s25, 4  ;;  %s513_s30 = scalar_lea.hbm %s556_s1, %s237_s27  ;;  %135 = vst [vmem:[%s132_s25] sm:$0xff] %v133_v0  ;;  %136 = vst [vmem:[%s132_s25 + $0x8] sm:$0xff] %v134_v1  ;;  %s508_s26 = int_to_ptr.vmem [resolvable:$true] %s152_s26 }
  0x39   : > { %s138_s17 = scalar_lea.sflag [#allocation4], %s499_s21  ;;  %s314_s2 = scalar_lea.vmem %s508_s26, 256 }
  0x3a   : > { %p315_p6 = scmp.ne.s32.totalorder %s508_s26, %s314_s2  ;;  %p565_p11 = scmp.ne.s32.totalorder %s560_s18, 0 }
  0x3b   : > { %s383_s10 = smov [#allocation5]  }
  0x3c   : > { %p316_p12 = pnand %p315_p6, %p565_p11  ;;  %s318_s3 = sshll.u32 %s383_s10, 4  ;;  %s319_s3 = int_to_ptr.vmem [resolvable:$false] %s318_s3 }
  0x3d   : > { %s320_s4 = scalar_lea.vmem %s319_s3, 512  ;;  %p321_p7 = scmp.lt.s32.totalorder %s508_s26, %s319_s3 }
  0x3e   : > { %p317_p13 = pneg %p316_p12  ;;  %p322_p10 = scmp.lt.s32.totalorder %s320_s4, %s314_s2 }
  0x40   : > { %p323_p2 = por %p322_p10, %p321_p7 }
  0x42   : > { %p324_p4 = pnand %p323_p2, %p317_p13 }
  0x44   : > { %327 = shalt.err (!%p324_p4)
}
  0x45   : > { %s328_s5 = scalar_lea.hbm %s513_s30, 256  ;;  %s332_s14 = scalar_lea.hbm %s556_s1, 512 }
  0x46   : > { %p329_p5 = scmp.ne.s32.totalorder %s513_s30, %s328_s5  ;;  %p333_p0 = scmp.lt.u32.totalorder %s513_s30, %s556_s1 }
  0x47   : > { %p334_p1 = scmp.lt.u32.totalorder %s332_s14, %s328_s5  ;;  %p336_p6 = scmp.lt.u32.totalorder %s328_s5, %s513_s30 }
  0x48   : > { %p330_p8 = pnand %p329_p5, %p565_p11 }
  0x49   : > { %p335_p3 = por %p334_p1, %p333_p0 }
  0x4a   : > { %p331_p9 = pneg %p330_p8 }
  0x4b   : > { %p337_p12 = por %p336_p6, %p335_p3 }
  0x4d   : > { %p338_p13 = pnand %p337_p12, %p331_p9 }
  0x4f   : > { %341 = shalt.err (!%p338_p13)
}
  0x50   : > { %240 = dma.vmem_to_hbm [thread:$0]  (%p565_p11), %s508_s26, 256, %s513_s30, %s138_s17  }
  0x51 PF: > { %s164_s21 = sand.u32 1, %s368_s6   ;;  %p566_p7 = scmp.ne.s32.totalorder %s561_s19, 0 }
  0x52   : > { %p567_p10 = scmp.ge.s32.totalorder %s380_s9, 2  ;;  %s165_s22 = scalar_lea.sflag [#allocation4], %s164_s21 }
  0x54   : > { %p247_p2 = pnand %p567_p10, %p566_p7 }
  0x56   : > { %363 = dma.done.wait (!%p247_p2), %s165_s22, 256  }
  0x57   : > { %365 = vsyncadd (!%p247_p2), %s165_s22, 4294967040  ;;  %p14_p4 = scmp.ge.s32.totalorder %s419_s12, 4   ;;  %s568_s6 = smov %s372_s7 }
  0x58   : > { %s569_s7 = smov %s376_s8  ;;  %s570_s8 = smov %s431_s15 }
  0x59   : > { %s571_s9 = smov %s419_s12  ;;  %16 = sbr.rel (!%p14_p4) target bundleno = 5 (0x5), region = 69 }
  0x60   :  { %170 = vsyncpa [#allocation3], 1 }
  0x61   :  { %172 = vsyncpa [#allocation3 + $0x1], 1 }
  0x62   :  { %173 = vsyncpa [#allocation4], 1 }
  0x63   :  { %175 = vsyncpa [#allocation4 + $0x1], 1 }

</bundles_post_ra>
